<compile_context>
chip_gen: v5e
topology: v5e:2x2
jax: 0.10.0
libtpu: 0.0.40
codegen_flags: <defaults>
</compile_context>

<pallas_src>
import functools

import jax
import jax.numpy as jnp
from jax import lax
from jax.experimental import pallas as pl
from jax.experimental.pallas import tpu as pltpu


def _round_up(x, m):
    return ((x + m - 1) // m) * m


def _focal_loss_kernel(logits_ref, tgt_ref, *rest, gamma, n_true, tile_n,
                       has_alpha, mask_rows):
    if has_alpha:
        alpha_ref, out_ref = rest
    else:
        (out_ref,) = rest

    i = pl.program_id(0)

    x = logits_ref[...].astype(jnp.float32)            # (T, C) f32
    t, c = x.shape
    tgt = tgt_ref[...]                                  # (T, 1) int32

    if mask_rows:
        # Ragged last tile: rows >= n_true hold undefined data.  Mask them
        # BEFORE the max/exp so garbage (possibly NaN) never propagates.
        row_ids = i * tile_n + lax.broadcasted_iota(jnp.int32, (t, 1), 0)
        row_valid = row_ids < n_true                    # (T, 1) bool
        x = jnp.where(row_valid, x, 0.0)

    class_ids = lax.broadcasted_iota(jnp.int32, (t, c), 1)
    onehot = class_ids == tgt                           # (T, C) bool

    # Numerically stable cross entropy: select target logit from the raw
    # (masked) logits, subtract row_max only at (T, 1) granularity.
    row_max = jnp.max(x, axis=-1, keepdims=True)                         # (T,1)
    logit_t = jnp.sum(jnp.where(onehot, x, 0.0), axis=-1, keepdims=True)  # (T,1)
    sum_exp = jnp.sum(jnp.exp(x - row_max), axis=-1, keepdims=True)       # (T,1)

    ce = (jnp.log(sum_exp) + row_max) - logit_t                          # (T,1)
    pt = jnp.exp(-ce)
    one_minus_pt = jnp.maximum(1.0 - pt, 0.0)

    if float(gamma).is_integer():
        w = lax.integer_pow(one_minus_pt, int(gamma))    # VPU only, no NaN at pt~1
    else:
        w = jnp.where(one_minus_pt > 0.0,
                      jnp.exp(gamma * jnp.log(jnp.maximum(one_minus_pt, 1e-30))),
                      0.0)

    focal = w * ce                                                        # (T,1)

    if has_alpha:
        alpha_row = rest[0][...].astype(jnp.float32)     # (1, C)
        alpha_t = jnp.sum(jnp.where(onehot, alpha_row, 0.0),
                          axis=-1, keepdims=True)        # (T, 1)
        focal = alpha_t * focal

    if mask_rows:
        focal = jnp.where(row_valid, focal, 0.0)

    out_ref[...] = focal


def focal_loss(logits, target, alpha=None, gamma=2.0, reduction="mean",
               tile_n=None):
    """logits: (N, C) float (f32 or bf16), target: (N,) int, alpha: (C,) float
    or None.  reduction in {'mean', 'sum', 'none'}."""
    n, c = logits.shape
    target2d = target.astype(jnp.int32).reshape(n, 1)

    # --- tile size: ~6 MiB input tile, with the f32 working set capped well
    #     inside v7x's 64 MiB VMEM (double-buffered input + ~4 live f32 tiles)
    itemsize = jnp.dtype(logits.dtype).itemsize
    if tile_n is None:
        tile_n = (6 * 1024 * 1024) // (c * itemsize)
        tile_n = min(tile_n, (32 * 1024 * 1024) // (c * 4 * 4))
    tile_n = max(8, (int(tile_n) // 8) * 8)
    tile_n = min(tile_n, max(8, _round_up(n, 8)))        # never exceed the batch

    grid = (pl.cdiv(n, tile_n),)
    mask_rows = (n % tile_n) != 0
    has_alpha = alpha is not None

    in_specs = [
        pl.BlockSpec((tile_n, c), lambda i: (i, 0)),     # full class dim per block
        pl.BlockSpec((tile_n, 1), lambda i: (i, 0)),
    ]
    operands = [logits, target2d]
    if has_alpha:
        alpha_row = alpha.astype(jnp.float32).reshape(1, c)
        in_specs.append(pl.BlockSpec((1, c), lambda i: (0, 0)))
        operands.append(alpha_row)

    kernel = functools.partial(
        _focal_loss_kernel, gamma=float(gamma), n_true=n, tile_n=tile_n,
        has_alpha=has_alpha, mask_rows=mask_rows)

    per_row = pl.pallas_call(
        kernel,
        out_shape=jax.ShapeDtypeStruct((n, 1), jnp.float32),
        grid=grid,
        in_specs=in_specs,
        out_specs=pl.BlockSpec((tile_n, 1), lambda i: (i, 0)),
        compiler_params=pltpu.CompilerParams(
            dimension_semantics=("parallel",),           # megacore on v7x
            vmem_limit_bytes=48 * 1024 * 1024,
        ),
    )(*operands)[:, 0]

    if reduction == "mean":
        return jnp.mean(per_row)
    elif reduction == "sum":
        return jnp.sum(per_row)
    elif reduction == "none":
        return per_row
    else:
        raise ValueError("reduction must be 'mean', 'sum' or 'none'")


def focal_loss_ref(logits, target, alpha=None, gamma=2.0, reduction="mean"):
    """Pure-JAX reference matching torch F.cross_entropy + focal weighting."""
    logits = logits.astype(jnp.float32)
    logp = jax.nn.log_softmax(logits, axis=-1)
    ce = -jnp.take_along_axis(logp, target[:, None].astype(jnp.int32), axis=-1)[:, 0]
    pt = jnp.exp(-ce)
    focal = ((1.0 - pt) ** gamma) * ce
    if alpha is not None:
        focal = alpha.astype(jnp.float32)[target] * focal
    if reduction == "mean":
        return jnp.mean(focal)
    elif reduction == "sum":
        return jnp.sum(focal)
    return focal


if __name__ == "__main__":
    key = jax.random.PRNGKey(0)
    k1, k2 = jax.random.split(key)

    # Small, deliberately "awkward" shapes: C=40 (not a lane multiple),
    # N=50 (not a tile multiple) to exercise the in-kernel row masking and
    # the multi-tile parallel path (tile_n=16 -> 4 grid steps, ragged last).
    N, C = 50, 40
    logits = jax.random.normal(k1, (N, C), dtype=jnp.float32)
    target = jax.random.randint(k2, (N,), 0, C, dtype=jnp.int32)
    alpha = 0.25 + 0.5 * (jnp.arange(C, dtype=jnp.float32) / C)

    # 1) multi-tile path with per-class alpha, ragged last tile, mean
    out = jax.block_until_ready(focal_loss(logits, target, alpha, gamma=2.0, tile_n=16))
    ref = focal_loss_ref(logits, target, alpha, gamma=2.0)
    assert jnp.allclose(out, ref, rtol=1e-5, atol=1e-5), (out, ref)

    # 2) default tile (single masked block), alpha=None, sum + none reductions
    out2 = jax.block_until_ready(focal_loss(logits, target, None, gamma=2.0,
                                            reduction="sum"))
    ref2 = focal_loss_ref(logits, target, None, gamma=2.0, reduction="sum")
    assert jnp.allclose(out2, ref2, rtol=1e-5, atol=1e-5), (out2, ref2)

    out3 = jax.block_until_ready(focal_loss(logits, target, alpha, gamma=2.0,
                                            reduction="none"))
    ref3 = focal_loss_ref(logits, target, alpha, gamma=2.0, reduction="none")
    assert jnp.allclose(out3, ref3, rtol=1e-5, atol=1e-5)

    # 3) bf16 logits path (no wrapper cast; f32 math inside the kernel)
    logits_bf16 = logits.astype(jnp.bfloat16)
    out4 = jax.block_until_ready(focal_loss(logits_bf16, target, alpha, gamma=2.0))
    ref4 = focal_loss_ref(logits_bf16, target, alpha, gamma=2.0)
    assert jnp.allclose(out4, ref4, rtol=1e-3, atol=1e-3), (out4, ref4)

    print("KERNEL_OK")
</pallas_src>

<mosaic_0001>
module attributes {stable_mosaic.version = 11 : i64} {
  func.func @_focal_loss_kernel(%arg0: i32, %arg1: memref<16x40xf32, #tpu.memory_space<vmem>>, %arg2: memref<16x1xi32, #tpu.memory_space<vmem>>, %arg3: memref<1x40xf32, #tpu.memory_space<vmem>>, %arg4: memref<16x1xf32, #tpu.memory_space<vmem>>) attributes {dimension_semantics = [#tpu.dimension_semantics<parallel>], iteration_bounds = array<i64: 4>, scalar_prefetch = 0 : i64, scratch_operands = 0 : i64, tpu.core_type = #tpu.core_type<tc>, window_params = [{transform_indices = @transform_0, window_bounds = array<i64: 16, 40>}, {transform_indices = @transform_1, window_bounds = array<i64: 16, 1>}, {pipeline_mode = #tpu.pipeline_mode<synchronous>, transform_indices = @transform_2, window_bounds = array<i64: 1, 40>}, {transform_indices = @transform_3, window_bounds = array<i64: 16, 1>}]} {
    %c0 = arith.constant 0 : index
    %c0_0 = arith.constant 0 : index
    %0 = vector.load %arg1[%c0, %c0_0] : memref<16x40xf32, #tpu.memory_space<vmem>>, vector<16x40xf32>
    %c0_1 = arith.constant 0 : index
    %c0_2 = arith.constant 0 : index
    %1 = vector.load %arg2[%c0_1, %c0_2] : memref<16x1xi32, #tpu.memory_space<vmem>>, vector<16x1xi32>
    %c16_i32 = arith.constant 16 : i32
    %2 = arith.muli %arg0, %c16_i32 : i32
    %3 = tpu.iota {dimensions = array<i32: 0>} : vector<16x1xi32>
    %4 = vector.broadcast %2 : i32 to vector<16x1xi32>
    %5 = arith.addi %4, %3 : vector<16x1xi32>
    %c50_i32 = arith.constant 50 : i32
    %6 = vector.broadcast %c50_i32 : i32 to vector<16x1xi32>
    %7 = arith.cmpi slt, %5, %6 : vector<16x1xi32>
    %cst = arith.constant 0.000000e+00 : f32
    %8 = vector.shape_cast %7 : vector<16x1xi1> to vector<16x1xi1>
    %9 = vector.broadcast %8 : vector<16x1xi1> to vector<16x40xi1>
    %10 = vector.broadcast %cst : f32 to vector<16x40xf32>
    %11 = arith.select %9, %0, %10 : vector<16x40xi1>, vector<16x40xf32>
    %12 = tpu.iota {dimensions = array<i32: 1>} : vector<16x40xi32>
    %13 = vector.broadcast %1 : vector<16x1xi32> to vector<16x40xi32>
    %14 = arith.cmpi eq, %12, %13 : vector<16x40xi32>
    %cst_3 = arith.constant dense<0xFF800000> : vector<16xf32>
    %15 = vector.multi_reduction <maximumf>, %11, %cst_3 [1] : vector<16x40xf32> to vector<16xf32>
    %16 = vector.shape_cast %15 : vector<16xf32> to vector<16x1xf32>
    %cst_4 = arith.constant 0.000000e+00 : f32
    %17 = vector.broadcast %cst_4 : f32 to vector<16x40xf32>
    %18 = arith.select %14, %11, %17 : vector<16x40xi1>, vector<16x40xf32>
    %cst_5 = arith.constant dense<0.000000e+00> : vector<16xf32>
    %19 = vector.multi_reduction <add>, %18, %cst_5 [1] : vector<16x40xf32> to vector<16xf32>
    %20 = vector.shape_cast %19 : vector<16xf32> to vector<16x1xf32>
    %21 = vector.broadcast %16 : vector<16x1xf32> to vector<16x40xf32>
    %22 = arith.subf %11, %21 : vector<16x40xf32>
    %23 = math.exp %22 : vector<16x40xf32>
    %cst_6 = arith.constant dense<0.000000e+00> : vector<16xf32>
    %24 = vector.multi_reduction <add>, %23, %cst_6 [1] : vector<16x40xf32> to vector<16xf32>
    %25 = vector.shape_cast %24 : vector<16xf32> to vector<16x1xf32>
    %26 = math.log %25 : vector<16x1xf32>
    %27 = arith.addf %26, %16 : vector<16x1xf32>
    %28 = arith.subf %27, %20 : vector<16x1xf32>
    %cst_7 = arith.constant 0.000000e+00 : f32
    %29 = vector.broadcast %cst_7 : f32 to vector<16x1xf32>
    %30 = arith.subf %29, %28 : vector<16x1xf32>
    %31 = math.exp %30 : vector<16x1xf32>
    %cst_8 = arith.constant 1.000000e+00 : f32
    %32 = vector.broadcast %cst_8 : f32 to vector<16x1xf32>
    %33 = arith.subf %32, %31 : vector<16x1xf32>
    %cst_9 = arith.constant 0.000000e+00 : f32
    %34 = vector.broadcast %cst_9 : f32 to vector<16x1xf32>
    %35 = arith.maximumf %33, %34 : vector<16x1xf32>
    %36 = arith.mulf %35, %35 : vector<16x1xf32>
    %37 = arith.mulf %36, %28 : vector<16x1xf32>
    %c0_10 = arith.constant 0 : index
    %c0_11 = arith.constant 0 : index
    %38 = vector.load %arg3[%c0_10, %c0_11] : memref<1x40xf32, #tpu.memory_space<vmem>>, vector<1x40xf32>
    %cst_12 = arith.constant 0.000000e+00 : f32
    %39 = vector.shape_cast %38 : vector<1x40xf32> to vector<1x40xf32>
    %40 = vector.broadcast %39 : vector<1x40xf32> to vector<16x40xf32>
    %41 = vector.broadcast %cst_12 : f32 to vector<16x40xf32>
    %42 = arith.select %14, %40, %41 : vector<16x40xi1>, vector<16x40xf32>
    %cst_13 = arith.constant dense<0.000000e+00> : vector<16xf32>
    %43 = vector.multi_reduction <add>, %42, %cst_13 [1] : vector<16x40xf32> to vector<16xf32>
    %44 = vector.shape_cast %43 : vector<16xf32> to vector<16x1xf32>
    %45 = arith.mulf %44, %37 : vector<16x1xf32>
    %cst_14 = arith.constant 0.000000e+00 : f32
    %46 = vector.broadcast %cst_14 : f32 to vector<16x1xf32>
    %47 = arith.select %7, %45, %46 : vector<16x1xi1>, vector<16x1xf32>
    %c0_15 = arith.constant 0 : index
    %c0_16 = arith.constant 0 : index
    %48 = vector.load %arg4[%c0_15, %c0_16] : memref<16x1xf32, #tpu.memory_space<vmem>>, vector<16x1xf32>
    tpu.vector_store %arg4[%c0_15, %c0_16], %47 {strides = array<i32>} : memref<16x1xf32, #tpu.memory_space<vmem>>, vector<16x1xf32>,
    return
  }
  func.func @transform_0(%arg0: i32) -> (i32, i32) {
    %c0_i32 = arith.constant 0 : i32
    %c0_i32_0 = arith.constant 0 : i32
    return %arg0, %c0_i32 : i32, i32
  }
  func.func @transform_1(%arg0: i32) -> (i32, i32) {
    %c0_i32 = arith.constant 0 : i32
    %c0_i32_0 = arith.constant 0 : i32
    return %arg0, %c0_i32 : i32, i32
  }
  func.func @transform_2(%arg0: i32) -> (i32, i32) {
    %c0_i32 = arith.constant 0 : i32
    %c0_i32_0 = arith.constant 0 : i32
    %c0_i32_1 = arith.constant 0 : i32
    return %c0_i32, %c0_i32_0 : i32, i32
  }
  func.func @transform_3(%arg0: i32) -> (i32, i32) {
    %c0_i32 = arith.constant 0 : i32
    %c0_i32_0 = arith.constant 0 : i32
    return %arg0, %c0_i32 : i32, i32
  }
}

</mosaic_0001>

<bundles_post_ra>
// kernel: tpu_custom_call.1
= control target key start
LH: loop header
LB: loop body
LE: loop exit
PB: predicated region body
PF: predicated region fallthrough
CT: control target
= control target key end

     0   :  { %s806_s12 = smov 0   ;;  %s808_s13 = smov 0   ;;  %s923_s0 = inlined_call_operand.vmem [shape: f32[50,40], index: 0, kind: input, shape index: {}]   ;;  %s924_s1 = inlined_call_operand.vmem [shape: s32[50,1], index: 1, kind: input, shape index: {}]   ;;  %s925_s2 = inlined_call_operand.vmem [shape: f32[1,40], index: 2, kind: input, shape index: {}]   ;;  %s926_s3 = inlined_call_operand.vmem [shape: f32[50,1], index: 3, kind: output, shape index: {}]  }
   0x1   :  { %s810_s14 = smov 0  }
   0x2 LB: > { %s819_s15 = sadd.s32 4294967295, %s751_s14   ;;  %s821_s16 = sadd.s32 1, %s751_s14   ;;  %s751_s14 = sphi %s810_s14, %s930_s14   ;;  %s747_s13 = sphi %s808_s13, %s929_s13   ;;  %s743_s12 = sphi %s806_s12, %s928_s12  }
   0x3   : > { %s90_s17 = ssub.s32 %s751_s14, %s821_s16  ;;  %s93_s18 = sadd.s32 1, %s747_s13 }
   0x4   : > { %p91_p0 = scmp.eq.s32.totalorder %s90_s17, 0  ;;  %p103_p1 = scmp.ne.s32.totalorder %s747_s13, %s743_s12 }
   0x5   : > { %p104_p2 = scmp.eq.s32.totalorder %s819_s15, 3  ;;  %p566_p3 = scmp.ge.s32.totalorder %s751_s14, 1 }
   0x6   : > { %s829_s19 = scalar_select %p91_p0, %s747_s13, %s93_s18  }
   0x7   : > { %p831_p4 = por %p104_p2, %p103_p1  ;;  %p165_p5 = scmp.lt.s32.totalorder %s751_s14, 5 }
   0x9   : > { %p166_p6 = pnand %p566_p3, %p165_p5 }
   0xa   : > { %s836_s21 = sshll.u32 (!%p166_p6), %s819_s15, 1  ;;  %s572_s22 = sshll.u32 (!%p166_p6), %s819_s15, 4 }
   0xb   : > { %169 = sbr.rel (%p166_p6) target bundleno = 352 (0x160), region = 32  ;;  %p206_p7 = scmp.lt.s32.totalorder (!%p166_p6), %s836_s21, 6 }
   0xc   : > { %s198_s6 = sand.u32 (!%p166_p6), 1, %s743_s12  }
   0xd   : > { %s567_s7 = sshll.u32 (!%p166_p6), %s198_s6, 4 }
   0xe   : > { %s875_s8 = scalar_lea.vmem (!%p166_p6), [#allocation2], %s567_s7  }
  0x10   : > { %v239_v0 = vlaneseq  ;;  %v242_v1 = vstv %s572_s22  ;;  %v785_v2 = vmov 0   ;;  %s207_s23 = scalar_select %p206_p7, %s836_s21, 6  ;;  %vm263_vm1 = vcmask 326656   ;;  %v684_v22 = vld [vmem:[%s925_s2] ss:$0 sm:$0xff] }
  0x11   : > { %682 = vset.pattern.permute.xlu1 %v785_v2  ;;  %683 = vset.pattern.permute.xlu0 %v785_v2  ;;  %vm328_vm5 = vcmask 7168   ;;  %s339_s9 = ssub.s32 (%p831_p4), 7, %s836_s21  ;;  %s889_s12 = scalar_lea.vmem (%p831_p4), %s926_s3, %s572_s22  }
  0x12   : > { %v240_v3 = vshrl.u32 %v239_v0, 7  ;;  %s569_s24 = sshll.u32 %s207_s23, 3  ;;  %v254_v15 = vand.u32 127, %v239_v0  ;;  %p340_p8 = scmp.lt.s32.totalorder (%p831_p4), %s339_s9, 2 }
  0x13   : > { %s209_s27 = scalar_lea.vmem %s923_s0, %s569_s24  ;;  %s223_s30 = scalar_lea.vmem %s924_s1, %s569_s24 }
  0x14   : > { %v843_v4 = vadd.s32 %v242_v1, %v240_v3  ;;  %v241_v5 = vadd.s32 8, %v240_v3  ;;  %v234_v7 = vld [vmem:[%s209_s27] sm:$0xff]  ;;  %v235_v11 = vld [vmem:[%s209_s27 + $0x8] sm:$0xff] }
  0x15   : > { %v236_v8 = vld [vmem:[%s223_s30] sm:$0xff]  ;;  %v237_v13 = vld [vmem:[%s223_s30 + $0x8] sm:$0xff] }
  0x16   : > { %vm245_vm0 = vcmp.lt.s32.totalorder %v843_v4, 50  ;;  %v849_v6 = vadd.s32 %v242_v1, %v241_v5  ;;  %256 = vperm.xlu1 %682, %v236_v8  }
  0x17   : > { %v251_v9 = vsel %vm245_vm0, %v234_v7, 0.0 }
  0x18   : > { %v264_v10 = vsel %vm263_vm1, %v251_v9, -inf  ;;  %vm246_vm2 = vcmp.lt.s32.totalorder %v849_v6, 50 }
  0x19   : > { %265 = vmax.xlane.f32.xlu0 %v264_v10  ;;  %v252_v12 = vsel %vm246_vm2, %v235_v11, 0.0 }
  0x1a   : > { %v267_v14 = vsel %vm263_vm1, %v252_v12, -inf }
  0x1e   : > { %259 = vperm.xlu1 %682, %v237_v13  }
  0x21   : > { %268 = vmax.xlane.f32.xlu0 %v267_v14 }
  0x88   : > { %v257_v16 = vpop.permute.xlu1 %256 }
  0x89   : > { %vm261_vm3 = vcmp.eq.s32.totalorder %v254_v15, %v257_v16 }
  0x8a   : > { %v270_v17 = vsel %vm261_vm3, %v251_v9, 0.0  ;;  %v316_v35 = vsel %vm261_vm3, %v684_v22, 0.0 }
  0x8b   : > { %v272_v19 = vsel %vm263_vm1, %v270_v17, 0.0  ;;  %v318_v36 = vsel %vm263_vm1, %v316_v35, 0.0 }
  0x8c   : > { %v266_v18 = vpop.xlane.xlu0 %265  ;;  %273 = vadd.xlane.f32.xlu0 %v272_v19 }
  0x8d   : > { %v278_v20 = vsub.f32 %v251_v9, %v266_v18 }
  0x8f   : > { %v280_v21 = vmul.f32 1.442695, %v278_v20 }
  0x90   : > { %v260_v23 = vpop.permute.xlu1 %259 }
  0x91   : > { %685 = vpow2.f32 %v280_v21  ;;  %vm262_vm4 = vcmp.eq.s32.totalorder %v254_v15, %v260_v23 }
  0x92   : > { %v271_v24 = vsel %vm262_vm4, %v252_v12, 0.0  ;;  %v317_v25 = vsel %vm262_vm4, %v684_v22, 0.0 }
  0x93   : > { %v275_v27 = vsel %vm263_vm1, %v271_v24, 0.0  ;;  %v321_v28 = vsel %vm263_vm1, %v317_v25, 0.0 }
  0x94   : > { %v269_v26 = vpop.xlane.xlu0 %268  ;;  %276 = vadd.xlane.f32.xlu1 %v275_v27  ;;  %322 = vadd.xlane.f32.xlu0 %v321_v28 }
  0x95   : > { %v279_v29 = vsub.f32 %v252_v12, %v269_v26 }
  0x97   : > { %v686_v30 = vpop.eup %685  ;;  %v282_v31 = vmul.f32 1.442695, %v279_v29 }
  0x98   : > { %v284_v32 = vsel %vm263_vm1, %v686_v30, 0.0 }
  0x99   : > { %687 = vpow2.f32 %v282_v31  ;;  %285 = vadd.xlane.f32.xlu2 %v284_v32 }
  0x9f   : > { %v688_v33 = vpop.eup %687 }
  0xa0   : > { %v287_v34 = vsel %vm263_vm1, %v688_v33, 0.0 }
  0xa1   : > { %288 = vadd.xlane.f32.xlu2 %v287_v34 }
  0xa9   : > { %319 = vadd.xlane.f32.xlu2 %v318_v36 }
  0xff   : > { %v274_v42 = vpop.xlane.xlu0 %273 }
 0x107   : > { %v277_v49 = vpop.xlane.xlu1 %276  ;;  %v323_v2 = vpop.xlane.xlu0 %322 }
 0x10c   : > { %v286_v37 = vpop.xlane.xlu2 %285 }
 0x10d   : > { %689 = vlog2.f32 %v286_v37 }
 0x113   : > { %v690_v38 = vpop.eup %689 }
 0x114   : > { %v291_v39 = vmul.f32 0.6931472, %v690_v38  ;;  %v289_v40 = vpop.xlane.xlu2 %288 }
 0x115   : > { %691 = vlog2.f32 %v289_v40 }
 0x116   : > { %v294_v41 = vadd.f32 %v291_v39, %v266_v18 }
 0x118   : > { %v296_v43 = vsub.f32 %v294_v41, %v274_v42 }
 0x11a   : > { %v298_v44 = vsub.f32 0.0, %v296_v43 }
 0x11b   : > { %v692_v45 = vpop.eup %691 }
 0x11c   : > { %v300_v46 = vmul.f32 1.442695, %v298_v44  ;;  %v293_v47 = vmul.f32 0.6931472, %v692_v45  ;;  %v320_v59 = vpop.xlane.xlu2 %319 }
 0x11e   : > { %693 = vpow2.f32 %v300_v46  ;;  %v295_v48 = vadd.f32 %v293_v47, %v269_v26 }
 0x120   : > { %v297_v50 = vsub.f32 %v295_v48, %v277_v49 }
 0x122   : > { %v299_v51 = vsub.f32 0.0, %v297_v50 }
 0x124   : > { %v694_v52 = vpop.eup %693  ;;  %v302_v53 = vmul.f32 1.442695, %v299_v51 }
 0x125   : > { %v304_v54 = vsub.f32 1.0, %v694_v52 }
 0x126   : > { %695 = vpow2.f32 %v302_v53 }
 0x127   : > { %v306_v55 = vmax.f32 %v304_v54, 0.0 }
 0x129   : > { %v308_v56 = vmul.f32 %v306_v55, %v306_v55 }
 0x12b   : > { %v310_v57 = vmul.f32 %v308_v56, %v296_v43 }
 0x12c   : > { %v696_v58 = vpop.eup %695 }
 0x12d   : > { %v305_v60 = vsub.f32 1.0, %v696_v58  ;;  %v324_v61 = vmul.f32 %v320_v59, %v310_v57 }
 0x12f   : > { %v307_v62 = vmax.f32 %v305_v60, 0.0  ;;  %v326_v63 = vsel %vm245_vm0, %v324_v61, 0.0 }
 0x130   : > { %329 = vst.msk [vmem:[%s875_s8] sm:$0xff] %vm328_vm5, %v326_v63 }
 0x131   : > { %v309_v0 = vmul.f32 %v307_v62, %v307_v62 }
 0x133   : > { %v311_v1 = vmul.f32 %v309_v0, %v297_v50 }
 0x134   : > { %337 = sbr.rel (!%p831_p4) target bundleno = 352 (0x160), region = 36 }
 0x135   : > { %v325_v3 = vmul.f32 %v323_v2, %v311_v1 }
 0x137   : > { %v327_v5 = vsel %vm246_vm2, %v325_v3, 0.0 }
 0x138   : > { %330 = vst.msk [vmem:[%s875_s8 + $0x8] sm:$0xff] %vm328_vm5, %v327_v5 }
 0x139   : > { %s932_s9 = smov (!%p340_p8, %s339_s9), 2 }
 0x13a   : > { %s575_s14 = sshll.u32 %s932_s9, 3 }
 0x13b   : > { %p578_p9 = scmp.eq.s32.totalorder %s575_s14, 0 }
 0x13c   : > { %s895_s17 = sshrl.u32 (!%p578_p9), %s932_s9, 1 }
 0x13d   : > { %348 = sbr.rel (%p578_p9) target bundleno = 352 (0x160), region = 40  ;;  %p579_p10 = scmp.le.s32.totalorder (!%p578_p9), %s895_s17, 0 }
 0x142   : > { %513 = sbr.rel (%p579_p10) target bundleno = 335 (0x14f), region = 119  ;;  %s753_s15 = smov (!%p579_p10), %s889_s12  }
 0x143   : > { %s757_s18 = smov (!%p579_p10), %s875_s8   ;;  %s761_s20 = smov (!%p579_p10), 0  }
 0x144   : > { %s765_s21 = smov (!%p579_p10), 0  }
 0x147 LB: >> { %v413_v4 = vld [vmem:[%s759_s18] sm:$0xff]  ;;  %v415_v6 = vld [vmem:[%s759_s18 + $0x8] sm:$0xff]  ;;  %s417_s22 = sadd.s32 1, %s763_s20  ;;  %s407_s21 = sadd.s32 1, %s767_s21   ;;  %s767_s21 = sphi %s765_s21, %s407_s21   ;;  %s763_s20 = sphi %s761_s20, %s762_s20   ;;  %s759_s18 = sphi %s757_s18, %s422_s18   ;;  %s755_s15 = sphi %s753_s15, %s423_s15  }
 0x148   : >> { %414 = vst [vmem:[%s755_s15] sm:$0xff] %v413_v4  ;;  %p418_p11 = scmp.ge.s32.totalorder %s417_s22, %s895_s17  ;;  %p406_p12 = scmp.ge.s32.totalorder %s407_s21, %s895_s17 }
 0x149   : >> { %416 = vst [vmem:[%s755_s15 + $0x8] sm:$0xff] %v415_v6 }
 0x14a   : >> { %s934_s22 = smov (%p418_p11, %s417_s22), 0  ;;  %409 = sbr.rel (!%p406_p12) target bundleno = 327 (0x147), region = 125 }
 0x14b   : >> { %s580_s23 = sshll.u32 %s934_s22, 4  ;;  %s762_s20 = smov %s934_s22  }
 0x14c   : >> { %s422_s18 = scalar_lea.vmem %s875_s8, %s580_s23 [#allocation2]   ;;  %s423_s15 = scalar_lea.vmem %s889_s12, %s580_s23  }
 0x14f PF: > { %s905_s24 = sand.u32 1, %s932_s9   ;;  %s591_s25 = sshll.u32 %s895_s17, 4 }
 0x150   : > { %s428_s26 = scalar_lea.vmem %s875_s8, %s591_s25 [#allocation2]   ;;  %s430_s27 = scalar_lea.vmem %s889_s12, %s591_s25  }
 0x151   : > { %p585_p13 = scmp.le.s32.totalorder %s905_s24, 0 }
 0x152   : > { %s769_s28 = smov (!%p585_p13), %s430_s27   ;;  %s773_s29 = smov (!%p585_p13), %s428_s26  }
 0x153   : > { %527 = sbr.rel (%p585_p13) target bundleno = 352 (0x160), region = 130  ;;  %s777_s30 = smov (!%p585_p13), 0  }
 0x154   : > { %s781_s4 = smov (!%p585_p13), 0  }
 0x158 LB: >> { %v440_v7 = vld [vmem:[%s775_s29] sm:$0xff]  ;;  %s442_s5 = sadd.s32 1, %s779_s30  ;;  %s434_s4 = sadd.s32 1, %s783_s4   ;;  %s783_s4 = sphi %s781_s4, %s434_s4   ;;  %s779_s30 = sphi %s777_s30, %s778_s30   ;;  %s775_s29 = sphi %s773_s29, %s447_s29   ;;  %s771_s28 = sphi %s769_s28, %s448_s28  }
 0x159   : >> { %441 = vst [vmem:[%s771_s28] sm:$0xff] %v440_v7  ;;  %p443_p0 = scmp.ge.s32.totalorder %s442_s5, %s905_s24  ;;  %p433_p1 = scmp.ge.s32.totalorder %s434_s4, %s905_s24 }
 0x15b   : >> { %s936_s5 = smov (%p443_p0, %s442_s5), 0  ;;  %436 = sbr.rel (!%p433_p1) target bundleno = 344 (0x158), region = 136 }
 0x15c   : >> { %s586_s6 = sshll.u32 %s936_s5, 3  ;;  %s778_s30 = smov %s936_s5  }
 0x15d   : >> { %s447_s29 = scalar_lea.vmem %s428_s26, %s586_s6 [#allocation2]   ;;  %s448_s28 = scalar_lea.vmem %s430_s27, %s586_s6  }
 0x160 PF: > { %p10_p2 = scmp.ge.s32.totalorder %s821_s16, 6   ;;  %s928_s12 = smov %s747_s13 }
 0x161   : > { %s929_s13 = smov %s829_s19  ;;  %s930_s14 = smov %s821_s16 }
 0x162   :  { %12 = sbr.rel (!%p10_p2) target bundleno = 2 (0x2), region = 147 }

</bundles_post_ra>
